<compile_context>
chip_gen: v7x
topology: tpu7x:2x2x1
jax: 0.10.0
libtpu: 0.0.40
codegen_flags: <defaults>
</compile_context>

<pallas_src>
import functools

import jax
import jax.numpy as jnp
from jax import lax
from jax.experimental import pallas as pl
from jax.experimental.pallas import tpu as pltpu

KF = 7           # taps of the [7, 1] kernel (over F)
KT = 7           # taps of the [1, 7] kernel (over T)
HALO = KF // 2   # 3 frames of halo on each side for conv1


def prenet_kernel(xw_ref, w1_ref, w2_ref, b1_ref, b2_ref, o_ref, y_ref, *, T, BF):
    # xw_ref : (1, 1, Cin, (BF+6)*T)  haloed input window (lanes = frames*T)
    # w1_ref : (KF, Cout, Cin)        per-tap conv1 weights
    # w2_ref : (KT, Cout, Cout)       per-tap conv2 weights
    # b1_ref : (Cout, 1), b2_ref : (Cout, 1)
    # o_ref  : (1, Cout, BF*T)        lane-dense output block
    # y_ref  : (Cout, BF*T) f32 VMEM  conv1 accumulator / conv1->conv2 staging
    BFT = BF * T

    # ---- conv1 (7,1): per-tap accumulate into the f32 VMEM scratch. --------
    # The window carries a 3-frame zero halo, so tap kf just reads the static
    # slice starting at window frame kf (= output frame + kf - 3 globally);
    # "same" padding comes for free from the halo zeros.
    for kf in range(KF):
        xs = xw_ref[0, 0, :, pl.ds(kf * T, BFT)]            # (Cin, BF*T)
        c = jnp.dot(w1_ref[kf], xs, preferred_element_type=jnp.float32)
        if kf == 0:
            y_ref[...] = c + b1_ref[...]                     # bias added once
        else:
            y_ref[...] += c

    # ---- conv2 (1,7): per-tap roll along T + in-kernel validity mask. ------
    # valid(col, s): 0 <= (col % T) + s < T  -- zeroes both the frame-edge
    # positions ("same" padding) and anything the roll wrap-around leaks in.
    tpos = lax.broadcasted_iota(jnp.int32, (1, BFT), 1) % T  # (1, BF*T)
    y = y_ref[...]                                           # (Cout, BF*T) f32
    acc = None
    for kt in range(KT):
        s = kt - KT // 2
        if s == 0:
            ys = y
        else:
            ys = pltpu.roll(y, shift=(-s) % BFT, axis=1)     # ys[:, c] = y[:, c+s]
            ys = jnp.where((tpos + s >= 0) & (tpos + s < T), ys, 0.0)
        c = jnp.dot(w2_ref[kt], ys, preferred_element_type=jnp.float32)
        acc = c if acc is None else acc + c
    o_ref[0] = (acc + b2_ref[...]).astype(o_ref.dtype)


def _vmem_budget_bytes():
    """~75% of this generation's VMEM (v5e/v6e: 128 MiB, v7x: 64 MiB)."""
    try:
        cap = int(pltpu.get_tpu_info().vmem_capacity_bytes)
    except Exception:  # conservative fallback if the query is unavailable
        cap = 64 * 1024 * 1024
    return int(cap * 0.75)


def _choose_block_frames(F, T, Cin, Cout, itemsize, budget_bytes):
    """Largest frame-block BF (F % BF == 0, BF*T lane-aligned) fitting budget."""
    cands = [bf for bf in range(1, F + 1)
             if F % bf == 0 and (bf == F or (bf * T) % 128 == 0)]

    def per_step_bytes(bf):
        x_win = 2 * Cin * (bf + 2 * HALO) * T * itemsize   # double-buffered input window
        out_b = 2 * Cout * bf * T * itemsize               # double-buffered output block
        work = 5 * Cout * bf * T * 4                       # y scratch + conv2 working values
        return x_win + out_b + work

    fitting = [bf for bf in cands if per_step_bytes(bf) <= budget_bytes]
    return max(fitting) if fitting else min(cands)


def stream_prenet(x_nchw, w1, b1, w2, b2, *, block_frames=None):
    """x: [N, Cin, F, T]; w1: [Cout, Cin, 7, 1]; b1: [Cout];
    w2: [Cout, Cout, 1, 7]; b2: [Cout].  Returns [N, Cout, F, T]."""
    N, Cin, F, T = x_nchw.shape
    Cout = w1.shape[0]
    assert w1.shape == (Cout, Cin, KF, 1), w1.shape
    assert w2.shape == (Cout, Cout, 1, KT), w2.shape
    assert F >= 1 and T >= 1, (F, T)   # degenerate F/T are handled by halo + mask

    vmem_limit = _vmem_budget_bytes()
    itemsize = jnp.dtype(x_nchw.dtype).itemsize
    BF = (block_frames if block_frames is not None
          else _choose_block_frames(F, T, Cin, Cout, itemsize, vmem_limit // 2))
    assert F % BF == 0, (F, BF)
    assert BF == F or (BF * T) % 128 == 0, (BF, T)
    nF = F // BF
    BFT = BF * T
    WF = BF + 2 * HALO
    WFT = WF * T

    # Overlapping, zero-haloed frame windows of the input (the small tensor):
    # xw[n, fb, ci, w*T + t] = x[n, ci, fb*BF + w - 3, t]  (0 outside [0, F)).
    x_pad = jnp.pad(x_nchw, ((0, 0), (0, 0), (HALO, HALO), (0, 0)))
    frame_idx = (jnp.arange(nF) * BF)[:, None] + jnp.arange(WF)[None, :]
    xw = x_pad[:, :, frame_idx, :]                      # (N, Cin, nF, WF, T)
    xw = jnp.transpose(xw, (0, 2, 1, 3, 4)).reshape(N, nF, Cin, WFT)

    # Per-tap weight layout; biases as (Cout, 1) columns (broadcast over lanes).
    w1t = jnp.transpose(w1[:, :, :, 0], (2, 0, 1))      # (KF, Cout, Cin)
    w2t = jnp.transpose(w2[:, :, 0, :], (2, 0, 1))      # (KT, Cout, Cout)
    b1c = b1.reshape(Cout, 1)
    b2c = b2.reshape(Cout, 1)

    kernel = functools.partial(prenet_kernel, T=T, BF=BF)

    outf = pl.pallas_call(
        kernel,
        out_shape=jax.ShapeDtypeStruct((N, Cout, F * T), x_nchw.dtype),
        grid_spec=pltpu.PrefetchScalarGridSpec(
            num_scalar_prefetch=0,
            grid=(N, nF),
            in_specs=[
                pl.BlockSpec((1, 1, Cin, WFT), lambda n, fb: (n, fb, 0, 0)),
                pl.BlockSpec((KF, Cout, Cin), lambda n, fb: (0, 0, 0)),
                pl.BlockSpec((KT, Cout, Cout), lambda n, fb: (0, 0, 0)),
                pl.BlockSpec((Cout, 1), lambda n, fb: (0, 0)),
                pl.BlockSpec((Cout, 1), lambda n, fb: (0, 0)),
            ],
            out_specs=pl.BlockSpec((1, Cout, BFT), lambda n, fb: (n, 0, fb)),
            scratch_shapes=[pltpu.VMEM((Cout, BFT), jnp.float32)],
        ),
        compiler_params=pltpu.CompilerParams(
            dimension_semantics=("parallel", "parallel"),
            vmem_limit_bytes=vmem_limit,
        ),
    )(xw, w1t, w2t, b1c, b2c)

    # Free reshape back to NCHW (output was produced lane-dense over F*T).
    return outf.reshape(N, Cout, F, T)


def _reference(x_nchw, w1, b1, w2, b2):
    """Plain-JAX reference using lax.conv (mirrors the PyTorch Conv2d calls)."""
    dn = lax.conv_dimension_numbers(x_nchw.shape, w1.shape, ("NCHW", "OIHW", "NCHW"))
    y = lax.conv_general_dilated(x_nchw, w1, (1, 1), ((3, 3), (0, 0)),
                                 dimension_numbers=dn)
    y = y + b1.reshape(1, -1, 1, 1)
    dn2 = lax.conv_dimension_numbers(y.shape, w2.shape, ("NCHW", "OIHW", "NCHW"))
    z = lax.conv_general_dilated(y, w2, (1, 1), ((0, 0), (3, 3)),
                                 dimension_numbers=dn2)
    z = z + b2.reshape(1, -1, 1, 1)
    return z


if __name__ == "__main__":
    # Small shapes consistent with the module: [batch, channel_in, F, T].
    N, Cin, Cout, F, T = 2, 4, 8, 16, 16

    key = jax.random.PRNGKey(0)
    kx, k1, kb1, k2, kb2 = jax.random.split(key, 5)

    x = jax.random.normal(kx, (N, Cin, F, T), dtype=jnp.float32)
    # Deterministic synthetic parameters (shapes as nn.Conv2d would create).
    w1 = 0.1 * jax.random.normal(k1, (Cout, Cin, KF, 1), dtype=jnp.float32)
    b1 = 0.1 * jax.random.normal(kb1, (Cout,), dtype=jnp.float32)
    w2 = 0.1 * jax.random.normal(k2, (Cout, Cout, 1, KT), dtype=jnp.float32)
    b2 = 0.1 * jax.random.normal(kb2, (Cout,), dtype=jnp.float32)

    ref = _reference(x, w1, b1, w2, b2)

    # Explicit 8-frame blocks (2 F-blocks -> exercises the halo-window path).
    out_blocked = jax.block_until_ready(
        stream_prenet(x, w1, b1, w2, b2, block_frames=8))
    assert out_blocked.shape == (N, Cout, F, T), out_blocked.shape
    assert jnp.allclose(out_blocked, ref, rtol=1e-4, atol=1e-4), (
        float(jnp.max(jnp.abs(out_blocked - ref))))

    # Auto block size (chosen from the per-generation VMEM budget).
    out_auto = jax.block_until_ready(stream_prenet(x, w1, b1, w2, b2))
    assert jnp.allclose(out_auto, ref, rtol=1e-4, atol=1e-4), (
        float(jnp.max(jnp.abs(out_auto - ref))))

    print("KERNEL_OK")
</pallas_src>

<mosaic_0001>
module attributes {stable_mosaic.version = 11 : i64} {
  func.func @prenet_kernel(%arg0: i32, %arg1: i32, %arg2: memref<1x1x4x224xf32, #tpu.memory_space<vmem>>, %arg3: memref<7x8x4xf32, #tpu.memory_space<vmem>>, %arg4: memref<7x8x8xf32, #tpu.memory_space<vmem>>, %arg5: memref<8x1xf32, #tpu.memory_space<vmem>>, %arg6: memref<8x1xf32, #tpu.memory_space<vmem>>, %arg7: memref<1x8x128xf32, #tpu.memory_space<vmem>>, %arg8: memref<8x128xf32, #tpu.memory_space<vmem>>) attributes {dimension_semantics = [#tpu.dimension_semantics<parallel>, #tpu.dimension_semantics<parallel>], iteration_bounds = array<i64: 2, 2>, scalar_prefetch = 0 : i64, scratch_operands = 1 : i64, tpu.core_type = #tpu.core_type<tc>, window_params = [{transform_indices = @transform_0, window_bounds = array<i64: 1, 1, 4, 224>}, {pipeline_mode = #tpu.pipeline_mode<synchronous>, transform_indices = @transform_1, window_bounds = array<i64: 7, 8, 4>}, {pipeline_mode = #tpu.pipeline_mode<synchronous>, transform_indices = @transform_2, window_bounds = array<i64: 7, 8, 8>}, {pipeline_mode = #tpu.pipeline_mode<synchronous>, transform_indices = @transform_3, window_bounds = array<i64: 8, 1>}, {pipeline_mode = #tpu.pipeline_mode<synchronous>, transform_indices = @transform_4, window_bounds = array<i64: 8, 1>}, {transform_indices = @transform_5, window_bounds = array<i64: 1, 8, 128>}]} {
    %c0 = arith.constant 0 : index
    %c0_0 = arith.constant 0 : index
    %c0_1 = arith.constant 0 : index
    %c0_2 = arith.constant 0 : index
    %0 = vector.load %arg2[%c0, %c0_0, %c0_1, %c0_2] : memref<1x1x4x224xf32, #tpu.memory_space<vmem>>, vector<1x1x4x128xf32>
    %1 = vector.shape_cast %0 : vector<1x1x4x128xf32> to vector<4x128xf32>
    %c0_3 = arith.constant 0 : index
    %c0_4 = arith.constant 0 : index
    %c0_5 = arith.constant 0 : index
    %2 = vector.load %arg3[%c0_3, %c0_4, %c0_5] : memref<7x8x4xf32, #tpu.memory_space<vmem>>, vector<1x8x4xf32>
    %3 = vector.shape_cast %2 : vector<1x8x4xf32> to vector<8x4xf32>
    %cst = arith.constant dense<0.000000e+00> : vector<8x128xf32>
    %4 = tpu.matmul %3, %1, %cst {dimension_numbers = #tpu.dot_dimension_numbers<[1], [0], [0], [1], [0, 0, 1, 1], [], []>} : vector<8x4xf32>, vector<4x128xf32>, vector<8x128xf32> -> vector<8x128xf32>
    %c0_6 = arith.constant 0 : index
    %c0_7 = arith.constant 0 : index
    %5 = vector.load %arg5[%c0_6, %c0_7] : memref<8x1xf32, #tpu.memory_space<vmem>>, vector<8x1xf32>
    %6 = vector.broadcast %5 : vector<8x1xf32> to vector<8x128xf32>
    %7 = arith.addf %4, %6 : vector<8x128xf32>
    %c0_8 = arith.constant 0 : index
    %c0_9 = arith.constant 0 : index
    %8 = vector.load %arg8[%c0_8, %c0_9] : memref<8x128xf32, #tpu.memory_space<vmem>>, vector<8x128xf32>
    tpu.vector_store %arg8[%c0_8, %c0_9], %7 {strides = array<i32>} : memref<8x128xf32, #tpu.memory_space<vmem>>, vector<8x128xf32>,
    %c0_10 = arith.constant 0 : index
    %c0_11 = arith.constant 0 : index
    %c0_12 = arith.constant 0 : index
    %c16 = arith.constant 16 : index
    %9 = vector.load %arg2[%c0_10, %c0_11, %c0_12, %c16] : memref<1x1x4x224xf32, #tpu.memory_space<vmem>>, vector<1x1x4x128xf32>
    %10 = vector.shape_cast %9 : vector<1x1x4x128xf32> to vector<4x128xf32>
    %c1 = arith.constant 1 : index
    %c0_13 = arith.constant 0 : index
    %c0_14 = arith.constant 0 : index
    %11 = vector.load %arg3[%c1, %c0_13, %c0_14] : memref<7x8x4xf32, #tpu.memory_space<vmem>>, vector<1x8x4xf32>
    %12 = vector.shape_cast %11 : vector<1x8x4xf32> to vector<8x4xf32>
    %cst_15 = arith.constant dense<0.000000e+00> : vector<8x128xf32>
    %13 = tpu.matmul %12, %10, %cst_15 {dimension_numbers = #tpu.dot_dimension_numbers<[1], [0], [0], [1], [0, 0, 1, 1], [], []>} : vector<8x4xf32>, vector<4x128xf32>, vector<8x128xf32> -> vector<8x128xf32>
    %c0_16 = arith.constant 0 : index
    %c0_17 = arith.constant 0 : index
    %14 = vector.load %arg8[%c0_16, %c0_17] : memref<8x128xf32, #tpu.memory_space<vmem>>, vector<8x128xf32>
    %15 = arith.addf %14, %13 : vector<8x128xf32>
    %c0_18 = arith.constant 0 : index
    %c0_19 = arith.constant 0 : index
    %16 = vector.load %arg8[%c0_18, %c0_19] : memref<8x128xf32, #tpu.memory_space<vmem>>, vector<8x128xf32>
    tpu.vector_store %arg8[%c0_18, %c0_19], %15 {strides = array<i32>} : memref<8x128xf32, #tpu.memory_space<vmem>>, vector<8x128xf32>,
    %c0_20 = arith.constant 0 : index
    %c0_21 = arith.constant 0 : index
    %c0_22 = arith.constant 0 : index
    %c32 = arith.constant 32 : index
    %17 = vector.load %arg2[%c0_20, %c0_21, %c0_22, %c32] : memref<1x1x4x224xf32, #tpu.memory_space<vmem>>, vector<1x1x4x128xf32>
    %18 = vector.shape_cast %17 : vector<1x1x4x128xf32> to vector<4x128xf32>
    %c2 = arith.constant 2 : index
    %c0_23 = arith.constant 0 : index
    %c0_24 = arith.constant 0 : index
    %19 = vector.load %arg3[%c2, %c0_23, %c0_24] : memref<7x8x4xf32, #tpu.memory_space<vmem>>, vector<1x8x4xf32>
    %20 = vector.shape_cast %19 : vector<1x8x4xf32> to vector<8x4xf32>
    %cst_25 = arith.constant dense<0.000000e+00> : vector<8x128xf32>
    %21 = tpu.matmul %20, %18, %cst_25 {dimension_numbers = #tpu.dot_dimension_numbers<[1], [0], [0], [1], [0, 0, 1, 1], [], []>} : vector<8x4xf32>, vector<4x128xf32>, vector<8x128xf32> -> vector<8x128xf32>
    %c0_26 = arith.constant 0 : index
    %c0_27 = arith.constant 0 : index
    %22 = vector.load %arg8[%c0_26, %c0_27] : memref<8x128xf32, #tpu.memory_space<vmem>>, vector<8x128xf32>
    %23 = arith.addf %22, %21 : vector<8x128xf32>
    %c0_28 = arith.constant 0 : index
    %c0_29 = arith.constant 0 : index
    %24 = vector.load %arg8[%c0_28, %c0_29] : memref<8x128xf32, #tpu.memory_space<vmem>>, vector<8x128xf32>
    tpu.vector_store %arg8[%c0_28, %c0_29], %23 {strides = array<i32>} : memref<8x128xf32, #tpu.memory_space<vmem>>, vector<8x128xf32>,
    %c0_30 = arith.constant 0 : index
    %c0_31 = arith.constant 0 : index
    %c0_32 = arith.constant 0 : index
    %c48 = arith.constant 48 : index
    %25 = vector.load %arg2[%c0_30, %c0_31, %c0_32, %c48] : memref<1x1x4x224xf32, #tpu.memory_space<vmem>>, vector<1x1x4x128xf32>
    %26 = vector.shape_cast %25 : vector<1x1x4x128xf32> to vector<4x128xf32>
    %c3 = arith.constant 3 : index
    %c0_33 = arith.constant 0 : index
    %c0_34 = arith.constant 0 : index
    %27 = vector.load %arg3[%c3, %c0_33, %c0_34] : memref<7x8x4xf32, #tpu.memory_space<vmem>>, vector<1x8x4xf32>
    %28 = vector.shape_cast %27 : vector<1x8x4xf32> to vector<8x4xf32>
    %cst_35 = arith.constant dense<0.000000e+00> : vector<8x128xf32>
    %29 = tpu.matmul %28, %26, %cst_35 {dimension_numbers = #tpu.dot_dimension_numbers<[1], [0], [0], [1], [0, 0, 1, 1], [], []>} : vector<8x4xf32>, vector<4x128xf32>, vector<8x128xf32> -> vector<8x128xf32>
    %c0_36 = arith.constant 0 : index
    %c0_37 = arith.constant 0 : index
    %30 = vector.load %arg8[%c0_36, %c0_37] : memref<8x128xf32, #tpu.memory_space<vmem>>, vector<8x128xf32>
    %31 = arith.addf %30, %29 : vector<8x128xf32>
    %c0_38 = arith.constant 0 : index
    %c0_39 = arith.constant 0 : index
    %32 = vector.load %arg8[%c0_38, %c0_39] : memref<8x128xf32, #tpu.memory_space<vmem>>, vector<8x128xf32>
    tpu.vector_store %arg8[%c0_38, %c0_39], %31 {strides = array<i32>} : memref<8x128xf32, #tpu.memory_space<vmem>>, vector<8x128xf32>,
    %c0_40 = arith.constant 0 : index
    %c0_41 = arith.constant 0 : index
    %c0_42 = arith.constant 0 : index
    %c64 = arith.constant 64 : index
    %33 = vector.load %arg2[%c0_40, %c0_41, %c0_42, %c64] : memref<1x1x4x224xf32, #tpu.memory_space<vmem>>, vector<1x1x4x128xf32>
    %34 = vector.shape_cast %33 : vector<1x1x4x128xf32> to vector<4x128xf32>
    %c4 = arith.constant 4 : index
    %c0_43 = arith.constant 0 : index
    %c0_44 = arith.constant 0 : index
    %35 = vector.load %arg3[%c4, %c0_43, %c0_44] : memref<7x8x4xf32, #tpu.memory_space<vmem>>, vector<1x8x4xf32>
    %36 = vector.shape_cast %35 : vector<1x8x4xf32> to vector<8x4xf32>
    %cst_45 = arith.constant dense<0.000000e+00> : vector<8x128xf32>
    %37 = tpu.matmul %36, %34, %cst_45 {dimension_numbers = #tpu.dot_dimension_numbers<[1], [0], [0], [1], [0, 0, 1, 1], [], []>} : vector<8x4xf32>, vector<4x128xf32>, vector<8x128xf32> -> vector<8x128xf32>
    %c0_46 = arith.constant 0 : index
    %c0_47 = arith.constant 0 : index
    %38 = vector.load %arg8[%c0_46, %c0_47] : memref<8x128xf32, #tpu.memory_space<vmem>>, vector<8x128xf32>
    %39 = arith.addf %38, %37 : vector<8x128xf32>
    %c0_48 = arith.constant 0 : index
    %c0_49 = arith.constant 0 : index
    %40 = vector.load %arg8[%c0_48, %c0_49] : memref<8x128xf32, #tpu.memory_space<vmem>>, vector<8x128xf32>
    tpu.vector_store %arg8[%c0_48, %c0_49], %39 {strides = array<i32>} : memref<8x128xf32, #tpu.memory_space<vmem>>, vector<8x128xf32>,
    %c0_50 = arith.constant 0 : index
    %c0_51 = arith.constant 0 : index
    %c0_52 = arith.constant 0 : index
    %c80 = arith.constant 80 : index
    %41 = vector.load %arg2[%c0_50, %c0_51, %c0_52, %c80] : memref<1x1x4x224xf32, #tpu.memory_space<vmem>>, vector<1x1x4x128xf32>
    %42 = vector.shape_cast %41 : vector<1x1x4x128xf32> to vector<4x128xf32>
    %c5 = arith.constant 5 : index
    %c0_53 = arith.constant 0 : index
    %c0_54 = arith.constant 0 : index
    %43 = vector.load %arg3[%c5, %c0_53, %c0_54] : memref<7x8x4xf32, #tpu.memory_space<vmem>>, vector<1x8x4xf32>
    %44 = vector.shape_cast %43 : vector<1x8x4xf32> to vector<8x4xf32>
    %cst_55 = arith.constant dense<0.000000e+00> : vector<8x128xf32>
    %45 = tpu.matmul %44, %42, %cst_55 {dimension_numbers = #tpu.dot_dimension_numbers<[1], [0], [0], [1], [0, 0, 1, 1], [], []>} : vector<8x4xf32>, vector<4x128xf32>, vector<8x128xf32> -> vector<8x128xf32>
    %c0_56 = arith.constant 0 : index
    %c0_57 = arith.constant 0 : index
    %46 = vector.load %arg8[%c0_56, %c0_57] : memref<8x128xf32, #tpu.memory_space<vmem>>, vector<8x128xf32>
    %47 = arith.addf %46, %45 : vector<8x128xf32>
    %c0_58 = arith.constant 0 : index
    %c0_59 = arith.constant 0 : index
    %48 = vector.load %arg8[%c0_58, %c0_59] : memref<8x128xf32, #tpu.memory_space<vmem>>, vector<8x128xf32>
    tpu.vector_store %arg8[%c0_58, %c0_59], %47 {strides = array<i32>} : memref<8x128xf32, #tpu.memory_space<vmem>>, vector<8x128xf32>,
    %c0_60 = arith.constant 0 : index
    %c0_61 = arith.constant 0 : index
    %c0_62 = arith.constant 0 : index
    %c96 = arith.constant 96 : index
    %49 = vector.load %arg2[%c0_60, %c0_61, %c0_62, %c96] : memref<1x1x4x224xf32, #tpu.memory_space<vmem>>, vector<1x1x4x128xf32>
    %50 = vector.shape_cast %49 : vector<1x1x4x128xf32> to vector<4x128xf32>
    %c6 = arith.constant 6 : index
    %c0_63 = arith.constant 0 : index
    %c0_64 = arith.constant 0 : index
    %51 = vector.load %arg3[%c6, %c0_63, %c0_64] : memref<7x8x4xf32, #tpu.memory_space<vmem>>, vector<1x8x4xf32>
    %52 = vector.shape_cast %51 : vector<1x8x4xf32> to vector<8x4xf32>
    %cst_65 = arith.constant dense<0.000000e+00> : vector<8x128xf32>
    %53 = tpu.matmul %52, %50, %cst_65 {dimension_numbers = #tpu.dot_dimension_numbers<[1], [0], [0], [1], [0, 0, 1, 1], [], []>} : vector<8x4xf32>, vector<4x128xf32>, vector<8x128xf32> -> vector<8x128xf32>
    %c0_66 = arith.constant 0 : index
    %c0_67 = arith.constant 0 : index
    %54 = vector.load %arg8[%c0_66, %c0_67] : memref<8x128xf32, #tpu.memory_space<vmem>>, vector<8x128xf32>
    %55 = arith.addf %54, %53 : vector<8x128xf32>
    %c0_68 = arith.constant 0 : index
    %c0_69 = arith.constant 0 : index
    %56 = vector.load %arg8[%c0_68, %c0_69] : memref<8x128xf32, #tpu.memory_space<vmem>>, vector<8x128xf32>
    tpu.vector_store %arg8[%c0_68, %c0_69], %55 {strides = array<i32>} : memref<8x128xf32, #tpu.memory_space<vmem>>, vector<8x128xf32>,
    %57 = tpu.iota {dimensions = array<i32: 1>} : vector<1x128xi32>
    %c16_i32 = arith.constant 16 : i32
    %c0_i32 = arith.constant 0 : i32
    %58 = arith.cmpi eq, %c16_i32, %c0_i32 : i32
    %c1_i32 = arith.constant 1 : i32
    %59 = arith.select %58, %c1_i32, %c16_i32 : i32
    %60 = vector.broadcast %59 : i32 to vector<1x128xi32>
    %61 = arith.remsi %57, %60 : vector<1x128xi32>
    %c0_i32_70 = arith.constant 0 : i32
    %62 = vector.broadcast %c0_i32_70 : i32 to vector<1x128xi32>
    %63 = arith.cmpi ne, %61, %62 : vector<1x128xi32>
    %c0_i32_71 = arith.constant 0 : i32
    %64 = vector.broadcast %c0_i32_71 : i32 to vector<1x128xi32>
    %65 = arith.cmpi slt, %61, %64 : vector<1x128xi32>
    %c0_i32_72 = arith.constant 0 : i32
    %66 = arith.cmpi slt, %59, %c0_i32_72 : i32
    %67 = vector.broadcast %66 : i1 to vector<1x128xi1>
    %68 = vector.broadcast %67 : vector<1x128xi1> to vector<1x128xi1>
    %69 = arith.xori %65, %68 : vector<1x128xi1>
    %70 = arith.andi %69, %63 : vector<1x128xi1>
    %71 = vector.broadcast %59 : i32 to vector<1x128xi32>
    %72 = arith.addi %61, %71 : vector<1x128xi32>
    %73 = arith.select %70, %72, %61 : vector<1x128xi1>, vector<1x128xi32>
    %c0_73 = arith.constant 0 : index
    %c0_74 = arith.constant 0 : index
    %74 = vector.load %arg8[%c0_73, %c0_74] : memref<8x128xf32, #tpu.memory_space<vmem>>, vector<8x128xf32>
    %c3_i32 = arith.constant 3 : i32
    %75 = tpu.dynamic_rotate %74 by %c3_i32 dim 1 : vector<8x128xf32>, i32 -> vector<8x128xf32>
    %c-3_i32 = arith.constant -3 : i32
    %76 = vector.broadcast %c-3_i32 : i32 to vector<1x128xi32>
    %77 = arith.addi %73, %76 : vector<1x128xi32>
    %c0_i32_75 = arith.constant 0 : i32
    %78 = vector.broadcast %c0_i32_75 : i32 to vector<1x128xi32>
    %79 = arith.cmpi sge, %77, %78 : vector<1x128xi32>
    %c-3_i32_76 = arith.constant -3 : i32
    %80 = vector.broadcast %c-3_i32_76 : i32 to vector<1x128xi32>
    %81 = arith.addi %73, %80 : vector<1x128xi32>
    %c16_i32_77 = arith.constant 16 : i32
    %82 = vector.broadcast %c16_i32_77 : i32 to vector<1x128xi32>
    %83 = arith.cmpi slt, %81, %82 : vector<1x128xi32>
    %84 = arith.andi %79, %83 : vector<1x128xi1>
    %cst_78 = arith.constant 0.000000e+00 : f32
    %85 = vector.shape_cast %84 : vector<1x128xi1> to vector<1x128xi1>
    %86 = vector.broadcast %85 : vector<1x128xi1> to vector<8x128xi1>
    %87 = vector.broadcast %cst_78 : f32 to vector<8x128xf32>
    %88 = arith.select %86, %75, %87 : vector<8x128xi1>, vector<8x128xf32>
    %c0_79 = arith.constant 0 : index
    %c0_80 = arith.constant 0 : index
    %c0_81 = arith.constant 0 : index
    %89 = vector.load %arg4[%c0_79, %c0_80, %c0_81] : memref<7x8x8xf32, #tpu.memory_space<vmem>>, vector<1x8x8xf32>
    %90 = vector.shape_cast %89 : vector<1x8x8xf32> to vector<8x8xf32>
    %cst_82 = arith.constant dense<0.000000e+00> : vector<8x128xf32>
    %91 = tpu.matmul %90, %88, %cst_82 {dimension_numbers = #tpu.dot_dimension_numbers<[1], [0], [0], [1], [0, 0, 1, 1], [], []>} : vector<8x8xf32>, vector<8x128xf32>, vector<8x128xf32> -> vector<8x128xf32>
    %c2_i32 = arith.constant 2 : i32
    %92 = tpu.dynamic_rotate %74 by %c2_i32 dim 1 : vector<8x128xf32>, i32 -> vector<8x128xf32>
    %c-2_i32 = arith.constant -2 : i32
    %93 = vector.broadcast %c-2_i32 : i32 to vector<1x128xi32>
    %94 = arith.addi %73, %93 : vector<1x128xi32>
    %c0_i32_83 = arith.constant 0 : i32
    %95 = vector.broadcast %c0_i32_83 : i32 to vector<1x128xi32>
    %96 = arith.cmpi sge, %94, %95 : vector<1x128xi32>
    %c-2_i32_84 = arith.constant -2 : i32
    %97 = vector.broadcast %c-2_i32_84 : i32 to vector<1x128xi32>
    %98 = arith.addi %73, %97 : vector<1x128xi32>
    %c16_i32_85 = arith.constant 16 : i32
    %99 = vector.broadcast %c16_i32_85 : i32 to vector<1x128xi32>
    %100 = arith.cmpi slt, %98, %99 : vector<1x128xi32>
    %101 = arith.andi %96, %100 : vector<1x128xi1>
    %cst_86 = arith.constant 0.000000e+00 : f32
    %102 = vector.shape_cast %101 : vector<1x128xi1> to vector<1x128xi1>
    %103 = vector.broadcast %102 : vector<1x128xi1> to vector<8x128xi1>
    %104 = vector.broadcast %cst_86 : f32 to vector<8x128xf32>
    %105 = arith.select %103, %92, %104 : vector<8x128xi1>, vector<8x128xf32>
    %c1_87 = arith.constant 1 : index
    %c0_88 = arith.constant 0 : index
    %c0_89 = arith.constant 0 : index
    %106 = vector.load %arg4[%c1_87, %c0_88, %c0_89] : memref<7x8x8xf32, #tpu.memory_space<vmem>>, vector<1x8x8xf32>
    %107 = vector.shape_cast %106 : vector<1x8x8xf32> to vector<8x8xf32>
    %cst_90 = arith.constant dense<0.000000e+00> : vector<8x128xf32>
    %108 = tpu.matmul %107, %105, %cst_90 {dimension_numbers = #tpu.dot_dimension_numbers<[1], [0], [0], [1], [0, 0, 1, 1], [], []>} : vector<8x8xf32>, vector<8x128xf32>, vector<8x128xf32> -> vector<8x128xf32>
    %109 = arith.addf %91, %108 : vector<8x128xf32>
    %c1_i32_91 = arith.constant 1 : i32
    %110 = tpu.dynamic_rotate %74 by %c1_i32_91 dim 1 : vector<8x128xf32>, i32 -> vector<8x128xf32>
    %c-1_i32 = arith.constant -1 : i32
    %111 = vector.broadcast %c-1_i32 : i32 to vector<1x128xi32>
    %112 = arith.addi %73, %111 : vector<1x128xi32>
    %c0_i32_92 = arith.constant 0 : i32
    %113 = vector.broadcast %c0_i32_92 : i32 to vector<1x128xi32>
    %114 = arith.cmpi sge, %112, %113 : vector<1x128xi32>
    %c-1_i32_93 = arith.constant -1 : i32
    %115 = vector.broadcast %c-1_i32_93 : i32 to vector<1x128xi32>
    %116 = arith.addi %73, %115 : vector<1x128xi32>
    %c16_i32_94 = arith.constant 16 : i32
    %117 = vector.broadcast %c16_i32_94 : i32 to vector<1x128xi32>
    %118 = arith.cmpi slt, %116, %117 : vector<1x128xi32>
    %119 = arith.andi %114, %118 : vector<1x128xi1>
    %cst_95 = arith.constant 0.000000e+00 : f32
    %120 = vector.shape_cast %119 : vector<1x128xi1> to vector<1x128xi1>
    %121 = vector.broadcast %120 : vector<1x128xi1> to vector<8x128xi1>
    %122 = vector.broadcast %cst_95 : f32 to vector<8x128xf32>
    %123 = arith.select %121, %110, %122 : vector<8x128xi1>, vector<8x128xf32>
    %c2_96 = arith.constant 2 : index
    %c0_97 = arith.constant 0 : index
    %c0_98 = arith.constant 0 : index
    %124 = vector.load %arg4[%c2_96, %c0_97, %c0_98] : memref<7x8x8xf32, #tpu.memory_space<vmem>>, vector<1x8x8xf32>
    %125 = vector.shape_cast %124 : vector<1x8x8xf32> to vector<8x8xf32>
    %cst_99 = arith.constant dense<0.000000e+00> : vector<8x128xf32>
    %126 = tpu.matmul %125, %123, %cst_99 {dimension_numbers = #tpu.dot_dimension_numbers<[1], [0], [0], [1], [0, 0, 1, 1], [], []>} : vector<8x8xf32>, vector<8x128xf32>, vector<8x128xf32> -> vector<8x128xf32>
    %127 = arith.addf %109, %126 : vector<8x128xf32>
    %c3_100 = arith.constant 3 : index
    %c0_101 = arith.constant 0 : index
    %c0_102 = arith.constant 0 : index
    %128 = vector.load %arg4[%c3_100, %c0_101, %c0_102] : memref<7x8x8xf32, #tpu.memory_space<vmem>>, vector<1x8x8xf32>
    %129 = vector.shape_cast %128 : vector<1x8x8xf32> to vector<8x8xf32>
    %cst_103 = arith.constant dense<0.000000e+00> : vector<8x128xf32>
    %130 = tpu.matmul %129, %74, %cst_103 {dimension_numbers = #tpu.dot_dimension_numbers<[1], [0], [0], [1], [0, 0, 1, 1], [], []>} : vector<8x8xf32>, vector<8x128xf32>, vector<8x128xf32> -> vector<8x128xf32>
    %131 = arith.addf %127, %130 : vector<8x128xf32>
    %c127_i32 = arith.constant 127 : i32
    %132 = tpu.dynamic_rotate %74 by %c127_i32 dim 1 : vector<8x128xf32>, i32 -> vector<8x128xf32>
    %c1_i32_104 = arith.constant 1 : i32
    %133 = vector.broadcast %c1_i32_104 : i32 to vector<1x128xi32>
    %134 = arith.addi %73, %133 : vector<1x128xi32>
    %c0_i32_105 = arith.constant 0 : i32
    %135 = vector.broadcast %c0_i32_105 : i32 to vector<1x128xi32>
    %136 = arith.cmpi sge, %134, %135 : vector<1x128xi32>
    %c1_i32_106 = arith.constant 1 : i32
    %137 = vector.broadcast %c1_i32_106 : i32 to vector<1x128xi32>
    %138 = arith.addi %73, %137 : vector<1x128xi32>
    %c16_i32_107 = arith.constant 16 : i32
    %139 = vector.broadcast %c16_i32_107 : i32 to vector<1x128xi32>
    %140 = arith.cmpi slt, %138, %139 : vector<1x128xi32>
    %141 = arith.andi %136, %140 : vector<1x128xi1>
    %cst_108 = arith.constant 0.000000e+00 : f32
    %142 = vector.shape_cast %141 : vector<1x128xi1> to vector<1x128xi1>
    %143 = vector.broadcast %142 : vector<1x128xi1> to vector<8x128xi1>
    %144 = vector.broadcast %cst_108 : f32 to vector<8x128xf32>
    %145 = arith.select %143, %132, %144 : vector<8x128xi1>, vector<8x128xf32>
    %c4_109 = arith.constant 4 : index
    %c0_110 = arith.constant 0 : index
    %c0_111 = arith.constant 0 : index
    %146 = vector.load %arg4[%c4_109, %c0_110, %c0_111] : memref<7x8x8xf32, #tpu.memory_space<vmem>>, vector<1x8x8xf32>
    %147 = vector.shape_cast %146 : vector<1x8x8xf32> to vector<8x8xf32>
    %cst_112 = arith.constant dense<0.000000e+00> : vector<8x128xf32>
    %148 = tpu.matmul %147, %145, %cst_112 {dimension_numbers = #tpu.dot_dimension_numbers<[1], [0], [0], [1], [0, 0, 1, 1], [], []>} : vector<8x8xf32>, vector<8x128xf32>, vector<8x128xf32> -> vector<8x128xf32>
    %149 = arith.addf %131, %148 : vector<8x128xf32>
    %c126_i32 = arith.constant 126 : i32
    %150 = tpu.dynamic_rotate %74 by %c126_i32 dim 1 : vector<8x128xf32>, i32 -> vector<8x128xf32>
    %c2_i32_113 = arith.constant 2 : i32
    %151 = vector.broadcast %c2_i32_113 : i32 to vector<1x128xi32>
    %152 = arith.addi %73, %151 : vector<1x128xi32>
    %c0_i32_114 = arith.constant 0 : i32
    %153 = vector.broadcast %c0_i32_114 : i32 to vector<1x128xi32>
    %154 = arith.cmpi sge, %152, %153 : vector<1x128xi32>
    %c2_i32_115 = arith.constant 2 : i32
    %155 = vector.broadcast %c2_i32_115 : i32 to vector<1x128xi32>
    %156 = arith.addi %73, %155 : vector<1x128xi32>
    %c16_i32_116 = arith.constant 16 : i32
    %157 = vector.broadcast %c16_i32_116 : i32 to vector<1x128xi32>
    %158 = arith.cmpi slt, %156, %157 : vector<1x128xi32>
    %159 = arith.andi %154, %158 : vector<1x128xi1>
    %cst_117 = arith.constant 0.000000e+00 : f32
    %160 = vector.shape_cast %159 : vector<1x128xi1> to vector<1x128xi1>
    %161 = vector.broadcast %160 : vector<1x128xi1> to vector<8x128xi1>
    %162 = vector.broadcast %cst_117 : f32 to vector<8x128xf32>
    %163 = arith.select %161, %150, %162 : vector<8x128xi1>, vector<8x128xf32>
    %c5_118 = arith.constant 5 : index
    %c0_119 = arith.constant 0 : index
    %c0_120 = arith.constant 0 : index
    %164 = vector.load %arg4[%c5_118, %c0_119, %c0_120] : memref<7x8x8xf32, #tpu.memory_space<vmem>>, vector<1x8x8xf32>
    %165 = vector.shape_cast %164 : vector<1x8x8xf32> to vector<8x8xf32>
    %cst_121 = arith.constant dense<0.000000e+00> : vector<8x128xf32>
    %166 = tpu.matmul %165, %163, %cst_121 {dimension_numbers = #tpu.dot_dimension_numbers<[1], [0], [0], [1], [0, 0, 1, 1], [], []>} : vector<8x8xf32>, vector<8x128xf32>, vector<8x128xf32> -> vector<8x128xf32>
    %167 = arith.addf %149, %166 : vector<8x128xf32>
    %c125_i32 = arith.constant 125 : i32
    %168 = tpu.dynamic_rotate %74 by %c125_i32 dim 1 : vector<8x128xf32>, i32 -> vector<8x128xf32>
    %c3_i32_122 = arith.constant 3 : i32
    %169 = vector.broadcast %c3_i32_122 : i32 to vector<1x128xi32>
    %170 = arith.addi %73, %169 : vector<1x128xi32>
    %c0_i32_123 = arith.constant 0 : i32
    %171 = vector.broadcast %c0_i32_123 : i32 to vector<1x128xi32>
    %172 = arith.cmpi sge, %170, %171 : vector<1x128xi32>
    %c3_i32_124 = arith.constant 3 : i32
    %173 = vector.broadcast %c3_i32_124 : i32 to vector<1x128xi32>
    %174 = arith.addi %73, %173 : vector<1x128xi32>
    %c16_i32_125 = arith.constant 16 : i32
    %175 = vector.broadcast %c16_i32_125 : i32 to vector<1x128xi32>
    %176 = arith.cmpi slt, %174, %175 : vector<1x128xi32>
    %177 = arith.andi %172, %176 : vector<1x128xi1>
    %cst_126 = arith.constant 0.000000e+00 : f32
    %178 = vector.shape_cast %177 : vector<1x128xi1> to vector<1x128xi1>
    %179 = vector.broadcast %178 : vector<1x128xi1> to vector<8x128xi1>
    %180 = vector.broadcast %cst_126 : f32 to vector<8x128xf32>
    %181 = arith.select %179, %168, %180 : vector<8x128xi1>, vector<8x128xf32>
    %c6_127 = arith.constant 6 : index
    %c0_128 = arith.constant 0 : index
    %c0_129 = arith.constant 0 : index
    %182 = vector.load %arg4[%c6_127, %c0_128, %c0_129] : memref<7x8x8xf32, #tpu.memory_space<vmem>>, vector<1x8x8xf32>
    %183 = vector.shape_cast %182 : vector<1x8x8xf32> to vector<8x8xf32>
    %cst_130 = arith.constant dense<0.000000e+00> : vector<8x128xf32>
    %184 = tpu.matmul %183, %181, %cst_130 {dimension_numbers = #tpu.dot_dimension_numbers<[1], [0], [0], [1], [0, 0, 1, 1], [], []>} : vector<8x8xf32>, vector<8x128xf32>, vector<8x128xf32> -> vector<8x128xf32>
    %185 = arith.addf %167, %184 : vector<8x128xf32>
    %c0_131 = arith.constant 0 : index
    %c0_132 = arith.constant 0 : index
    %186 = vector.load %arg6[%c0_131, %c0_132] : memref<8x1xf32, #tpu.memory_space<vmem>>, vector<8x1xf32>
    %187 = vector.broadcast %186 : vector<8x1xf32> to vector<8x128xf32>
    %188 = arith.addf %185, %187 : vector<8x128xf32>
    %c0_133 = arith.constant 0 : index
    %c0_134 = arith.constant 0 : index
    %c0_135 = arith.constant 0 : index
    %189 = vector.load %arg7[%c0_133, %c0_134, %c0_135] : memref<1x8x128xf32, #tpu.memory_space<vmem>>, vector<1x8x128xf32>
    %190 = vector.shape_cast %189 : vector<1x8x128xf32> to vector<8x128xf32>
    %191 = vector.shape_cast %188 : vector<8x128xf32> to vector<1x8x128xf32>
    tpu.vector_store %arg7[%c0_133, %c0_134, %c0_135], %191 {strides = array<i32>} : memref<1x8x128xf32, #tpu.memory_space<vmem>>, vector<1x8x128xf32>,
    return
  }
  func.func @transform_0(%arg0: i32, %arg1: i32) -> (i32, i32, i32, i32) {
    %c0_i32 = arith.constant 0 : i32
    %c0_i32_0 = arith.constant 0 : i32
    %c0_i32_1 = arith.constant 0 : i32
    return %arg0, %arg1, %c0_i32, %c0_i32_0 : i32, i32, i32, i32
  }
  func.func @transform_1(%arg0: i32, %arg1: i32) -> (i32, i32, i32) {
    %c0_i32 = arith.constant 0 : i32
    %c0_i32_0 = arith.constant 0 : i32
    %c0_i32_1 = arith.constant 0 : i32
    %c0_i32_2 = arith.constant 0 : i32
    return %c0_i32, %c0_i32_0, %c0_i32_1 : i32, i32, i32
  }
  func.func @transform_2(%arg0: i32, %arg1: i32) -> (i32, i32, i32) {
    %c0_i32 = arith.constant 0 : i32
    %c0_i32_0 = arith.constant 0 : i32
    %c0_i32_1 = arith.constant 0 : i32
    %c0_i32_2 = arith.constant 0 : i32
    return %c0_i32, %c0_i32_0, %c0_i32_1 : i32, i32, i32
  }
  func.func @transform_3(%arg0: i32, %arg1: i32) -> (i32, i32) {
    %c0_i32 = arith.constant 0 : i32
    %c0_i32_0 = arith.constant 0 : i32
    %c0_i32_1 = arith.constant 0 : i32
    return %c0_i32, %c0_i32_0 : i32, i32
  }
  func.func @transform_4(%arg0: i32, %arg1: i32) -> (i32, i32) {
    %c0_i32 = arith.constant 0 : i32
    %c0_i32_0 = arith.constant 0 : i32
    %c0_i32_1 = arith.constant 0 : i32
    return %c0_i32, %c0_i32_0 : i32, i32
  }
  func.func @transform_5(%arg0: i32, %arg1: i32) -> (i32, i32, i32) {
    %c0_i32 = arith.constant 0 : i32
    %c0_i32_0 = arith.constant 0 : i32
    return %arg0, %c0_i32, %arg1 : i32, i32, i32
  }
}

</mosaic_0001>

<bundles_post_ra>
// kernel: tpu_custom_call.1
= control target key start
LH: loop header
LB: loop body
LE: loop exit
PB: predicated region body
PF: predicated region fallthrough
CT: control target
= control target key end

     0   :  { %10 = vsyncpa [#allocation4], 0  ;;  %s2218_s0 = inlined_call_operand.vmem [shape: f32[2,2,4,224], index: 0, kind: input, shape index: {}]   ;;  %s2219_s1 = inlined_call_operand.vmem [shape: f32[7,8,4], index: 1, kind: input, shape index: {}]   ;;  %s2220_s2 = inlined_call_operand.vmem [shape: f32[7,8,8], index: 2, kind: input, shape index: {}]   ;;  %s2221_s3 = inlined_call_operand.vmem [shape: f32[8,1], index: 3, kind: input, shape index: {}]   ;;  %s2222_s4 = inlined_call_operand.vmem [shape: f32[8,1], index: 4, kind: input, shape index: {}]   ;;  %s2223_s5 = inlined_call_operand.hbm [shape: f32[2,8,256], index: 5, kind: output, shape index: {}]  }
   0x1   :  { %12 = vsyncpa [#allocation4 + $0x1], 0  ;;  %s1970_s18 = smov 0   ;;  %s1972_s19 = smov 0  }
   0x2   :  { %s1974_s20 = smov 0   ;;  %s1976_s21 = smov 0  }
   0x3   :  { %s1978_s22 = smov 0   ;;  %s1980_s23 = smov 0  }
   0x4   :  { %s1982_s24 = smov 0   ;;  %s1984_s25 = smov 0  }
   0x5 LB: > { %s1576_s26 = sadd.s32 4294967295, %s1922_s25   ;;  %s1577_s27 = sadd.s32 4294967294, %s1922_s25   ;;  %s1922_s25 = sphi %s1984_s25, %s18_s25   ;;  %s1918_s24 = sphi %s1982_s24, %s2235_s24   ;;  %s1914_s23 = sphi %s1980_s23, %s2234_s23   ;;  %s1910_s22 = sphi %s1978_s22, %s2233_s22   ;;  %s1906_s21 = sphi %s1976_s21, %s2232_s21   ;;  %s1902_s20 = sphi %s1974_s20, %s2231_s20   ;;  %s1898_s19 = sphi %s1972_s19, %s2230_s19   ;;  %s1894_s18 = sphi %s1970_s18, %s2229_s18  }
   0x6   : > { %s27_s28 = sadd.s32 1, %s1914_s23  ;;  %s30_s29 = sadd.s32 1, %s1918_s24 }
   0x7   : > { %p28_p0 = scmp.ge.s32.totalorder %s27_s28, 2  ;;  %p161_p1 = scmp.ne.s32.totalorder %s1902_s20, %s1898_s19 }
   0x8   : > { %p162_p2 = scmp.eq.s32.totalorder %s1576_s26, 3  ;;  %p167_p5 = scmp.ne.s32.totalorder %s1898_s19, %s1894_s18 }
   0x9   : > { %s2237_s28 = smov (%p28_p0, %s27_s28), 0  ;;  %s2239_s29 = smov (!%p28_p0, %s30_s29), %s1918_s24 }
   0xa   : > { %s147_s30 = ssub.s32 %s1914_s23, %s2237_s28  ;;  %p2021_p3 = por %p162_p2, %p161_p1 }
   0xb   : > { %p32_p4 = scmp.ge.s32.totalorder %s2239_s29, 2  ;;  %p168_p6 = scmp.eq.s32.totalorder %s1577_s27, 3 }
   0xc   : > { %p1580_p7 = scmp.ge.s32.totalorder %s1922_s25, 1  ;;  %p210_p9 = scmp.lt.s32.totalorder %s1922_s25, 5 }
   0xd   : > { %s2241_s29 = smov (%p32_p4, %s2239_s29), 0  ;;  %p2030_p8 = por %p168_p6, %p167_p5 }
   0xe   : > { %2226 = sst [smem:[#allocation6_spill]] %s2241_s29  ;;  %s146_s8 = ssub.s32 %s1918_s24, %s2241_s29 }
   0xf   : > { %s151_s9 = sadd.s32 1, %s1902_s20  ;;  %s148_s10 = sor.u32 %s147_s30, %s146_s8 }
  0x10   : > { %p211_p10 = pnand %p1580_p7, %p210_p9  ;;  %p149_p11 = scmp.eq.s32.totalorder %s148_s10, 0 }
  0x11   : > { %p242_p12 = scmp.lt.s32.totalorder (!%p211_p10), %s1910_s22, 1  ;;  %p244_p13 = scmp.lt.s32.totalorder (!%p211_p10), %s1906_s21, 1  ;;  %v1924_v0 = vmov (!%p211_p10), 0.0   ;;  %vm1925_vm0 = vmmov (!%p211_p10), 0   ;;  %vm263_vm1 = vcmask (!%p211_p10), 1043456   ;;  %v252_v3 = vld [vmem:[%s2219_s1] sm:$0xff] (!%p211_p10)  ;;  %v872_v36 = vlaneseq (!%p211_p10) }
  0x12   : > { %s2039_s11 = scalar_select %p149_p11, %s1902_s20, %s151_s9  }
  0x13   : > { %214 = sbr.rel (%p211_p10) target bundleno = 779 (0x30b), region = 40  ;;  %1657 = vmatprep.subr.mxu0 (!%p211_p10), %v1924_v0  ;;  %1659 = vmatprep.mubr.msk.f32.mxu0 (!%p211_p10), %vm1925_vm0, %v1924_v0  ;;  %vm259_vm2 = vcmask (!%p211_p10), 31744   ;;  %s1926_s10 = smov (!%p211_p10), 112   ;;  %v253_v5 = vld [vmem:[%s2221_s3] sm:$0xff] (!%p211_p10)  ;;  %v1932_v6 = vmov (!%p211_p10), 0   ;;  %vm347_vm3 = vcmask (!%p211_p10), 916480  }
  0x14   : > { %1692 = vmatprep.subr.mxu1 (!%p211_p10), %v1924_v0  ;;  %1694 = vmatprep.mubr.msk.f32.mxu1 (!%p211_p10), %vm1925_vm0, %v1924_v0  ;;  %s1927_s29 = smov (!%p211_p10), 96   ;;  %vm436_vm4 = vcmask (!%p211_p10), 785408   ;;  %v1587_v10 = vld [vmem:[%s2219_s1 + $0x8] sm:$0xff] (!%p211_p10)  ;;  %vm525_vm5 = vcmask (!%p211_p10), 654336   ;;  %v1590_v16 = vld [vmem:[%s2219_s1 + $0x10] sm:$0xff] (!%p211_p10)  ;;  %vm614_vm6 = vcmask (!%p211_p10), 523264  }
  0x15   : > { %1826 = vset.pattern.permute.xlu0 (!%p211_p10), %v1932_v6  ;;  %v1593_v20 = vld [vmem:[%s2219_s1 + $0x18] sm:$0xff] (!%p211_p10)  ;;  %vm703_vm7 = vcmask (!%p211_p10), 392192   ;;  %v1596_v24 = vld [vmem:[%s2219_s1 + $0x20] sm:$0xff] (!%p211_p10)  ;;  %vm792_vm8 = vcmask (!%p211_p10), 261120   ;;  %v1599_v28 = vld [vmem:[%s2219_s1 + $0x28] sm:$0xff] (!%p211_p10)  ;;  %s1935_s26 = smov (!%p211_p10), 126  }
  0x16   : > { %v1602_v30 = vld [vmem:[%s2219_s1 + $0x30] sm:$0xff] (!%p211_p10)  ;;  %s1936_s27 = smov (!%p211_p10), 3   ;;  %v1471_v35 = vld [vmem:[%s2222_s4] sm:$0xff] (!%p211_p10)  ;;  %s1937_s9 = smov (!%p211_p10), 127   ;;  %v873_v37 = vand.u32 (!%p211_p10), 127, %v872_v36  ;;  %v1605_v41 = vld [vmem:[%s2220_s2 + $0x8] sm:$0xff] (!%p211_p10) }
  0x17   : > { %vm908_vm10 = vcmask (!%p211_p10), 64512   ;;  %v896_v44 = vld [vmem:[%s2220_s2] sm:$0xff] (!%p211_p10)  ;;  %v1610_v47 = vld [vmem:[%s2220_s2 + $0x10] sm:$0xff] (!%p211_p10)  ;;  %v1613_v49 = vld [vmem:[%s2220_s2 + $0x18] sm:$0xff] (!%p211_p10) }
  0x18   : > { %v878_v38 = vand.u32 (!%p211_p10), 15, %v873_v37  ;;  %v1615_v52 = vld [vmem:[%s2220_s2 + $0x20] sm:$0xff] (!%p211_p10)  ;;  %v1618_v55 = vld [vmem:[%s2220_s2 + $0x28] sm:$0xff] (!%p211_p10)  ;;  %v1621_v57 = vld [vmem:[%s2220_s2 + $0x30] sm:$0xff] (!%p211_p10) }
  0x1a   : > { %s243_s12 = scalar_select %p242_p12, %s1910_s22, 1  ;;  %v899_v39 = vadd.s32 4294967294, %v878_v38  ;;  %v889_v40 = vadd.s32 4294967293, %v878_v38  ;;  %v1057_v43 = vadd.s32 4294967295, %v878_v38  ;;  %v1218_v48 = vadd.s32 1, %v878_v38 }
  0x1b   : > { %s245_s13 = scalar_select %p244_p13, %s1906_s21, 1  ;;  %v1303_v50 = vadd.s32 2, %v878_v38  ;;  %v1388_v53 = vadd.s32 3, %v878_v38 }
  0x1c   : > { %s1583_s14 = sshll.u32 %s243_s12, 2  ;;  %s1928_s12 = smov 80   ;;  %vm900_vm9 = vcmp.ge.s32.totalorder %v899_v39, 0  ;;  %vm890_vm11 = vcmp.ge.s32.totalorder %v889_v40, 0  ;;  %vm1058_vm12 = vcmp.ge.s32.totalorder %v1057_v43, 0  ;;  %vm1220_vm13 = vcmp.lt.s32.totalorder %v1218_v48, 16 }
  0x1d   : > { %s1582_s15 = sshll.u32 %s245_s13, 1  ;;  %s1929_s13 = smov 64   ;;  %vm1305_vm14 = vcmp.lt.s32.totalorder %v1303_v50, 16  ;;  %vm1390_vm15 = vcmp.lt.s32.totalorder %v1388_v53, 16 }
  0x1e   : > { %s248_s16 = sadd.s32 %s1583_s14, %s1582_s15  ;;  %s1930_s14 = smov 48  }
  0x1f   : > { %s1584_s17 = sshll.u32 %s248_s16, 2  ;;  %s1931_s15 = smov 32  }
  0x20   : > { %s250_s30 = scalar_lea.vmem %s2218_s0, %s1584_s17  ;;  %s1933_s17 = smov 1  }
  0x21   : > { %v338_v1 = vld [vmem:[%s250_s30] sm:$0xff] }
  0x22   : > { %v251_v2 = vld [vmem:[%s250_s30] sm:$0xf]  ;;  %343 = vrot.lane.b32.xlu0 %v338_v1, %s1926_s10  ;;  %v342_v4 = vcombine.high %v338_v1, %v338_v1  ;;  %432 = vrot.lane.b32.xlu1 %v338_v1, %s1927_s29 }
  0x23   : > { %1658 = vmatpush3.msk.msra.mxu0 %vm263_vm1, %v251_v2 }
  0x24   : > { %1660 = vmatmul.mubr.msk.f32.vlgmr.msra.gmra.mrb[0].mxu0 %vm259_vm2, %v252_v3  ;;  %1662 = vmatprep.subr.mxu0 %v1924_v0 }
  0x25   : > { %1664 = vmatprep.mubr.msk.f32.mxu0 %vm1925_vm0, %v1924_v0 }
  0x26   : > { %345 = vrot.lane.b32.xlu0 %v342_v4, %s1926_s10  ;;  %434 = vrot.lane.b32.xlu1 %v342_v4, %s1927_s29  ;;  %s1934_s29 = smov 2   ;;  %s1938_s10 = smov 125  }
  0x2a   : > { %523 = vrot.lane.b32.xlu1 %v342_v4, %s1928_s12  ;;  %521 = vrot.lane.b32.xlu0 %v338_v1, %s1928_s12 }
  0x2e   : > { %612 = vrot.lane.b32.xlu1 %v342_v4, %s1929_s13  ;;  %610 = vrot.lane.b32.xlu0 %v338_v1, %s1929_s13  ;;  %s239_s13 = sand.u32 1, %s1898_s19  }
  0x32   : > { %701 = vrot.lane.b32.xlu1 %v342_v4, %s1930_s14  ;;  %699 = vrot.lane.b32.xlu0 %v338_v1, %s1930_s14  ;;  %s1581_s14 = sshll.u32 %s239_s13, 3 }
  0x36   : > { %790 = vrot.lane.b32.xlu1 %v342_v4, %s1931_s15  ;;  %788 = vrot.lane.b32.xlu0 %v338_v1, %s1931_s15  ;;  %s1625_s15 = sshll.u32 %s1910_s22, 1 }
  0x37   : > { %s1491_s16 = sadd.s32 %s1906_s21, %s1625_s15  ;;  %s1480_s21 = scalar_lea.sflag [#allocation4], %s239_s13 }
  0x3a   : > { %256 = vperm.xlu0 %1826, %v253_v5  }
  0x94   : > { %v344_v7 = vpop.permute.xlu0 %343  ;;  %v433_v8 = vpop.permute.xlu1 %432 }
  0x98   : > { %v346_v9 = vpop.permute.xlu0 %345  ;;  %v435_v11 = vpop.permute.xlu1 %434 }
  0x99   : > { %v348_v12 = vsel %vm347_vm3, %v344_v7, %v346_v9  ;;  %v437_v13 = vsel %vm436_vm4, %v433_v8, %v435_v11 }
  0x9a   : > { %1663 = vmatpush3.msk.msra.mxu0 %vm263_vm1, %v348_v12 }
  0x9b   : > { %1665 = vmatmul.mubr.msk.f32.vlgmr.msra.gmra.mrb[0].mxu0 %vm259_vm2, %v1587_v10  ;;  %1667 = vmatprep.subr.mxu0 %v1924_v0 }
  0x9c   : > { %1668 = vmatpush3.msk.msra.mxu0 %vm263_vm1, %v437_v13  ;;  %1669 = vmatprep.mubr.msk.f32.mxu0 %vm1925_vm0, %v1924_v0  ;;  %v524_v14 = vpop.permute.xlu1 %523  ;;  %v522_v15 = vpop.permute.xlu0 %521 }
  0x9d   : > { %1672 = vmatprep.subr.mxu0 %v1924_v0  ;;  %v526_v17 = vsel %vm525_vm5, %v522_v15, %v524_v14 }
  0xa0   : > { %v613_v18 = vpop.permute.xlu1 %612  ;;  %v611_v19 = vpop.permute.xlu0 %610 }
  0xa1   : > { %v615_v21 = vsel %vm614_vm6, %v611_v19, %v613_v18 }
  0xa3   : > { %1670 = vmatmul.mubr.msk.f32.vlgmr.msra.gmra.mrb[0].mxu0 %vm259_vm2, %v1590_v16 }
  0xa4   : > { %1673 = vmatpush3.msk.msra.mxu0 %vm263_vm1, %v526_v17  ;;  %1674 = vmatprep.mubr.msk.f32.mxu0 %vm1925_vm0, %v1924_v0  ;;  %v702_v22 = vpop.permute.xlu1 %701  ;;  %v700_v23 = vpop.permute.xlu0 %699 }
  0xa5   : > { %1677 = vmatprep.subr.mxu0 %v1924_v0  ;;  %v704_v25 = vsel %vm703_vm7, %v700_v23, %v702_v22 }
  0xa8   : > { %v791_v26 = vpop.permute.xlu1 %790  ;;  %v789_v27 = vpop.permute.xlu0 %788 }
  0xa9   : > { %v793_v29 = vsel %vm792_vm8, %v789_v27, %v791_v26 }
  0xab   : > { %1675 = vmatmul.mubr.msk.f32.vlgmr.msra.gmra.mrb[0].mxu0 %vm259_vm2, %v1593_v20 }
  0xac   : > { %1678 = vmatpush3.msk.msra.mxu0 %vm263_vm1, %v615_v21  ;;  %1679 = vmatprep.mubr.msk.f32.mxu0 %vm1925_vm0, %v1924_v0 }
  0xad   : > { %1682 = vmatprep.subr.mxu0 %v1924_v0 }
  0xb3   : > { %1680 = vmatmul.mubr.msk.f32.vlgmr.msra.gmra.mrb[0].mxu0 %vm259_vm2, %v1596_v24 }
  0xb4   : > { %1683 = vmatpush3.msk.msra.mxu0 %vm263_vm1, %v704_v25  ;;  %1684 = vmatprep.mubr.msk.f32.mxu0 %vm1925_vm0, %v1924_v0 }
  0xb5   : > { %1687 = vmatprep.subr.mxu0 %v1924_v0 }
  0xb9   : > { %v257_v31 = vpop.permute.xlu0 %256 }
  0xbb   : > { %1685 = vmatmul.mubr.msk.f32.vlgmr.msra.gmra.mrb[0].mxu0 %vm259_vm2, %v1599_v28 }
  0xbc   : > { %1688 = vmatpush3.msk.msra.mxu0 %vm263_vm1, %v793_v29  ;;  %1689 = vmatprep.mubr.msk.f32.mxu0 %vm1925_vm0, %v1924_v0 }
  0xc3   : > { %1690 = vmatmul.mubr.msk.f32.vlgmr.msra.gmra.mrb[0].mxu0 %vm259_vm2, %v1602_v30 }
 0x196   : > { %v865_v32 = vpop.f32.mrb[0].mxu0 }
 0x197   : > { %v1727_v33 = vadd.f32 %v865_v32, %v257_v31  ;;  %v1691_v34 = vpop.f32.mrb[1].mxu0 }
 0x199   : > { %1055 = vrot.lane.b32.xlu0 %v1727_v33, %s1933_s17  ;;  %897 = vrot.lane.b32.xlu1 %v1727_v33, %s1934_s29  ;;  %s1626_s17 = sshll.u32 %s1491_s16, 7  ;;  %s241_s29 = scalar_lea.vmem [#allocation3], %s1581_s14 }
 0x19a   : > { %s2165_s8 = scalar_lea.hbm %s2223_s5, %s1626_s17 }
 0x19d   : > { %1301 = vrot.lane.b32.xlu0 %v1727_v33, %s1935_s26  ;;  %887 = vrot.lane.b32.xlu1 %v1727_v33, %s1936_s27  ;;  %s1495_s26 = sshll.u32 %s241_s29, 4  ;;  %s2167_s26 = int_to_ptr.vmem [resolvable:$true] %s1495_s26 }
 0x19e   : > { %s1828_s22 = scalar_lea.vmem %s2167_s26, 128 }
 0x19f   : > { %p1829_p0 = scmp.ne.s32.totalorder %s2167_s26, %s1828_s22 }
 0x1a1   : > { %1474 = vperm.xlu0 %1826, %v1471_v35   ;;  %1216 = vrot.lane.b32.xlu1 %v1727_v33, %s1937_s9  ;;  %p1830_p1 = pnand %p1829_p0, %p2021_p3  ;;  %s1939_s9 = smov [#allocation3]  }
 0x1a3   : > { %p1831_p2 = pneg %p1830_p1 }
 0x1a5   : > { %1386 = vrot.lane.b32.xlu1 %v1727_v33, %s1938_s10  ;;  %s1832_s10 = sshll.u32 %s1939_s9, 4  ;;  %s1833_s10 = int_to_ptr.vmem [resolvable:$false] %s1832_s10 }
 0x1a6   : > { %s1834_s12 = scalar_lea.vmem %s1833_s10, 256  ;;  %p1835_p4 = scmp.lt.s32.totalorder %s2167_s26, %s1833_s10 }
 0x1a7   : > { %p1836_p5 = scmp.lt.s32.totalorder %s1834_s12, %s1828_s22 }
 0x1a9   : > { %p1837_p6 = por %p1836_p5, %p1835_p4 }
 0x1ab   : > { %p1838_p7 = pnand %p1837_p6, %p1831_p2 }
 0x20b   : > { %v898_v42 = vpop.permute.xlu1 %897  ;;  %v1056_v46 = vpop.permute.xlu0 %1055 }
 0x20c   : > { %1693 = vmatpush3.msk.msra.mxu1 %vm900_vm9, %v898_v42 }
 0x20d   : > { %1695 = vmatmul.mubr.msk.f32.vlgmr.msra.gmra.mrb[0].mxu1 %vm908_vm10, %v1605_v41  ;;  %1697 = vmatprep.subr.mxu1 %v1924_v0 }
 0x20e   : > { %1699 = vmatprep.mubr.msk.f32.mxu1 %vm1925_vm0, %v1924_v0 }
 0x20f   : > { %v888_v45 = vpop.permute.xlu1 %887  ;;  %v1302_v54 = vpop.permute.xlu0 %1301 }
 0x210   : > { %1698 = vmatpush3.msk.msra.mxu1 %vm890_vm11, %v888_v45 }
 0x211   : > { %1700 = vmatmul.mubr.msk.f32.vlgmr.msra.gmra.mrb[2].mxu1 %vm908_vm10, %v896_v44  ;;  %1702 = vmatprep.subr.mxu1 %v1924_v0 }
 0x212   : > { %1703 = vmatpush3.msk.msra.mxu1 %vm1058_vm12, %v1056_v46  ;;  %1704 = vmatprep.mubr.msk.f32.mxu1 %vm1925_vm0, %v1924_v0 }
 0x213   : > { %1707 = vmatprep.subr.mxu1 %v1924_v0  ;;  %v1217_v51 = vpop.permute.xlu1 %1216 }
 0x215   : > { %1705 = vmatmul.mubr.msk.f32.vlgmr.msra.gmra.mrb[4].mxu1 %vm908_vm10, %v1610_v47 }
 0x216   : > { %1708 = vmatpush3.msra.mxu1 %v1727_v33  ;;  %1709 = vmatprep.mubr.msk.f32.mxu1 %vm1925_vm0, %v1924_v0 }
 0x217   : > { %1712 = vmatprep.subr.mxu1 %v1924_v0  ;;  %v1387_v56 = vpop.permute.xlu1 %1386 }
 0x219   : > { %1710 = vmatmul.mubr.msk.f32.vlgmr.msra.gmra.mrb[6].mxu1 %vm908_vm10, %v1613_v49 }
 0x21a   : > { %1713 = vmatpush3.msk.msra.mxu1 %vm1220_vm13, %v1217_v51  ;;  %1714 = vmatprep.mubr.msk.f32.mxu1 %vm1925_vm0, %v1924_v0 }
 0x21b   : > { %1717 = vmatprep.subr.mxu1 %v1924_v0 }
 0x21d   : > { %1715 = vmatmul.mubr.msk.f32.vlgmr.msra.gmra.mrb[8].mxu1 %vm908_vm10, %v1615_v52 }
 0x21e   : > { %1718 = vmatpush3.msk.msra.mxu1 %vm1305_vm14, %v1302_v54  ;;  %1719 = vmatprep.mubr.msk.f32.mxu1 %vm1925_vm0, %v1924_v0 }
 0x21f   : > { %1722 = vmatprep.subr.mxu1 %v1924_v0 }
 0x220   : > { %v1475_v14 = vpop.permute.xlu0 %1474 }
 0x221   : > { %1720 = vmatmul.mubr.msk.f32.vlgmr.msra.gmra.mrb[10].mxu1 %vm908_vm10, %v1618_v55 }
 0x222   : > { %1723 = vmatpush3.msk.msra.mxu1 %vm1390_vm15, %v1387_v56  ;;  %1724 = vmatprep.mubr.msk.f32.mxu1 %vm1925_vm0, %v1924_v0 }
 0x225   : > { %1725 = vmatmul.mubr.msk.f32.vlgmr.msra.gmra.mrb[12].mxu1 %vm908_vm10, %v1621_v57 }
 0x2e0   : > { %v978_v58 = vpop.f32.mrb[0].mxu1 }
 0x2e1   : > { %v1696_v59 = vpop.f32.mrb[1].mxu1 }
 0x2e4   : > { %v1051_v60 = vpop.f32.mrb[2].mxu1 }
 0x2e5   : > { %v1052_v61 = vadd.f32 %v1051_v60, %v978_v58  ;;  %v1701_v62 = vpop.f32.mrb[3].mxu1 }
 0x2e8   : > { %v1135_v63 = vpop.f32.mrb[4].mxu1 }
 0x2e9   : > { %v1139_v1 = vadd.f32 %v1135_v63, %v1052_v61  ;;  %v1706_v2 = vpop.f32.mrb[5].mxu1 }
 0x2ec   : > { %v1211_v3 = vpop.f32.mrb[6].mxu1 }
 0x2ed   : > { %v1215_v4 = vadd.f32 %v1211_v3, %v1139_v1  ;;  %v1711_v5 = vpop.f32.mrb[7].mxu1 }
 0x2f0   : > { %v1296_v0 = vpop.f32.mrb[8].mxu1 }
 0x2f1   : > { %v1300_v6 = vadd.f32 %v1296_v0, %v1215_v4  ;;  %v1716_v7 = vpop.f32.mrb[9].mxu1 }
 0x2f4   : > { %v1381_v8 = vpop.f32.mrb[10].mxu1 }
 0x2f5   : > { %v1385_v9 = vadd.f32 %v1381_v8, %v1300_v6  ;;  %v1721_v10 = vpop.f32.mrb[11].mxu1 }
 0x2f8   : > { %v1466_v11 = vpop.f32.mrb[12].mxu1 }
 0x2f9   : > { %v1470_v12 = vadd.f32 %v1466_v11, %v1385_v9  ;;  %v1726_v13 = vpop.f32.mrb[13].mxu1 }
 0x2fb   : > { %v1477_v15 = vadd.f32 %v1475_v14, %v1470_v12 }
 0x2fd   : > { %1478 = vst [vmem:[%s241_s29] sm:$0xff] %v1477_v15 }
 0x2fe   : > { %1841 = shalt.err (!%p1838_p7)
}
 0x2ff   : > { %s1842_s13 = scalar_lea.hbm %s2165_s8, 128  ;;  %s1846_s16 = scalar_lea.hbm %s2223_s5, 512 }
 0x300   : > { %p1843_p9 = scmp.ne.s32.totalorder %s2165_s8, %s1842_s13  ;;  %p1847_p12 = scmp.lt.u32.totalorder %s2165_s8, %s2223_s5 }
 0x301   : > { %p1848_p13 = scmp.lt.u32.totalorder %s1846_s16, %s1842_s13  ;;  %p1850_p1 = scmp.lt.u32.totalorder %s1842_s13, %s2165_s8 }
 0x302   : > { %p1844_p10 = pnand %p1843_p9, %p2021_p3 }
 0x303   : > { %p1849_p0 = por %p1848_p13, %p1847_p12 }
 0x304   : > { %p1845_p11 = pneg %p1844_p10 }
 0x305   : > { %p1851_p2 = por %p1850_p1, %p1849_p0 }
 0x307   : > { %p1852_p4 = pnand %p1851_p2, %p1845_p11 }
 0x309   : > { %1855 = shalt.err (!%p1852_p4)
}
 0x30a   : > { %1740 = dma.vmem_to_hbm [thread:$0]  (%p2021_p3), %s2167_s26, 128, %s2165_s8, %s1480_s21  }
 0x30b PF: > { %p1746_p5 = scmp.ge.s32.totalorder %s1922_s25, 2  ;;  %s1507_s27 = sand.u32 1, %s1894_s18  }
 0x30c   : > { %s1508_s30 = scalar_lea.sflag [#allocation4], %s1507_s27 }
 0x30d   : > { %p1743_p6 = pnand %p1746_p5, %p2030_p8 }
 0x30f   : > { %1889 = dma.done.wait (!%p1743_p6), %s1508_s30, 128  }
 0x310   : > { %1891 = vsyncadd (!%p1743_p6), %s1508_s30, 4294967168  ;;  %s18_s25 = sadd.s32 1, %s1922_s25   ;;  %s2228_s6 = sld [smem:[#allocation6_spill]] }
 0x311   : > { %p15_p7 = scmp.ge.s32.totalorder %s18_s25, 6   ;;  %s2229_s18 = smov %s1898_s19 }
 0x312   : > { %s2230_s19 = smov %s1902_s20  ;;  %s2231_s20 = smov %s2039_s11 }
 0x313   : > { %s2232_s21 = smov %s1914_s23  ;;  %s2233_s22 = smov %s1918_s24 }
 0x314   : > { %s2234_s23 = smov %s2237_s28  ;;  %17 = sbr.rel (!%p15_p7) target bundleno = 5 (0x5), region = 87 }
 0x316   : > { %s2235_s24 = smov %s2228_s6 }
 0x31b   :  { %1513 = vsyncpa [#allocation4], 1 }
 0x31c   :  { %1515 = vsyncpa [#allocation4 + $0x1], 1 }

</bundles_post_ra>
